<compile_context>
chip_gen: v5e
topology: v5e:2x2
jax: 0.10.0
libtpu: 0.0.40
codegen_flags: <defaults>
</compile_context>

<pallas_src>
import functools

import jax
import jax.numpy as jnp
from jax.experimental import pallas as pl
from jax.experimental.pallas import tpu as pltpu  # noqa: F401  (TPU backend)

LANE = 128     # lane width of a vreg / MXU tile
SUBLANE = 8    # f32 sublane count


def _dueling_dqn_kernel(x_ref, w1_ref, w2_ref, wh_ref, b_ref, out_ref,
                        *, action_size):
    x = x_ref[...]                                       # (Bp, S)
    b = b_ref[...]                                       # (8, 128); rows 0..2 used
    b1 = b[0:1, :]                                       # (1, 128) layer1 bias
    b2 = b[1:2, :]                                       # (1, 128) layer2 bias
    bh = b[2:3, :]                                       # (1, 128) fused-head bias

    # layer1 + ReLU  (hidden padded to 128 lanes; padding stays exactly 0)
    h1 = jnp.dot(x, w1_ref[...], preferred_element_type=jnp.float32) + b1
    h1 = jnp.maximum(h1, 0.0)                            # (Bp, 128)

    # layer2 + ReLU
    h2 = jnp.dot(h1, w2_ref[...], preferred_element_type=jnp.float32) + b2
    h2 = jnp.maximum(h2, 0.0)                            # (Bp, 128)

    # fused heads: lanes [0, A) = advantage, lane A = value, rest = padding
    heads = jnp.dot(h2, wh_ref[...], preferred_element_type=jnp.float32) + bh

    lane = jax.lax.broadcasted_iota(jnp.int32, heads.shape, dimension=1)

    # max over true advantage lanes only (padding masked to -inf)
    adv_only = jnp.where(lane < action_size, heads, -jnp.inf)
    adv_max = jnp.max(adv_only, axis=1, keepdims=True)   # (Bp, 1)  -> XLU

    # extract value lane without a 1-lane slice (masked sum -> XLU)
    val = jnp.sum(jnp.where(lane == action_size, heads, 0.0),
                  axis=1, keepdims=True)                 # (Bp, 1)

    # dueling combine; write the full lane-dense slab (wrapper slices [:, :A])
    out_ref[...] = val + (heads - adv_max)


def dueling_dqn_forward(state, packed_params, action_size):
    """state: (B, state_size) f32. packed_params from pack_params()."""
    w1p, w2p, whp, bias = packed_params
    B = state.shape[0]

    # pad batch to a sublane multiple so the (Bp, 128) tiles are fully aligned
    Bp = ((B + SUBLANE - 1) // SUBLANE) * SUBLANE
    if Bp != B:
        state = jnp.pad(state, ((0, Bp - B), (0, 0)))

    full = lambda arr: pl.BlockSpec(arr.shape, lambda: (0,) * arr.ndim)
    kernel = functools.partial(_dueling_dqn_kernel, action_size=action_size)

    out = pl.pallas_call(
        kernel,
        out_shape=jax.ShapeDtypeStruct((Bp, LANE), jnp.float32),
        in_specs=[full(state), full(w1p), full(w2p), full(whp), full(bias)],
        out_specs=pl.BlockSpec((Bp, LANE), lambda: (0, 0)),
    )(state, w1p, w2p, whp, bias)

    return out[:B, :action_size]


def init_params(key, state_size=8, action_size=4, hidden_size=64):
    """PyTorch-style nn.Linear default init (uniform +/- 1/sqrt(fan_in)).
    Weights stored (in_features, out_features)."""
    def linear(key, fan_in, fan_out):
        kw, kb = jax.random.split(key)
        bound = 1.0 / jnp.sqrt(fan_in)
        w = jax.random.uniform(kw, (fan_in, fan_out), jnp.float32, -bound, bound)
        b = jax.random.uniform(kb, (1, fan_out), jnp.float32, -bound, bound)
        return w, b

    k1, k2, k3, k4 = jax.random.split(key, 4)
    w1, b1 = linear(k1, state_size, hidden_size)
    w2, b2 = linear(k2, hidden_size, hidden_size)
    wa, ba = linear(k3, hidden_size, action_size)
    wv, bv = linear(k4, hidden_size, 1)
    return (w1, b1, w2, b2, wa, ba, wv, bv)


def pack_params(params):
    """Zero-pad hidden dim to 128, fuse the two heads into one (128,128) weight
    and all biases into one (8,128) buffer (rows 0/1/2 = b1/b2/b_heads)."""
    w1, b1, w2, b2, wa, ba, wv, bv = params
    S, H = w1.shape
    A = wa.shape[1]

    w1p = jnp.zeros((S, LANE), jnp.float32).at[:, :H].set(w1)
    w2p = jnp.zeros((LANE, LANE), jnp.float32).at[:H, :H].set(w2)

    wh = jnp.concatenate([wa, wv], axis=1)                       # (H, A+1)
    whp = jnp.zeros((LANE, LANE), jnp.float32).at[:H, :A + 1].set(wh)

    bh = jnp.concatenate([ba, bv], axis=1)                       # (1, A+1)
    bias = jnp.zeros((SUBLANE, LANE), jnp.float32)
    bias = bias.at[0, :H].set(b1[0])
    bias = bias.at[1, :H].set(b2[0])
    bias = bias.at[2, :A + 1].set(bh[0])
    return (w1p, w2p, whp, bias)


def reference_forward(state, params):
    w1, b1, w2, b2, wa, ba, wv, bv = params
    h1 = jnp.maximum(state @ w1 + b1, 0.0)
    h2 = jnp.maximum(h1 @ w2 + b2, 0.0)
    adv = h2 @ wa + ba
    val = h2 @ wv + bv
    return val + (adv - jnp.max(adv, axis=1, keepdims=True))


if __name__ == "__main__":
    key = jax.random.PRNGKey(0)
    kx, kp = jax.random.split(key)

    batch, state_size, action_size, hidden_size = 8, 8, 4, 64
    state = jax.random.normal(kx, (batch, state_size), jnp.float32)
    params = init_params(kp, state_size, action_size, hidden_size)
    packed = pack_params(params)

    out = dueling_dqn_forward(state, packed, action_size)
    out = jax.block_until_ready(out)

    ref = reference_forward(state, params)
    assert out.shape == (batch, action_size)
    assert jnp.allclose(out, ref, atol=1e-5, rtol=1e-5)

    print("KERNEL_OK")
</pallas_src>

<mosaic_0001>
module attributes {stable_mosaic.version = 11 : i64} {
  func.func @_dueling_dqn_kernel(%arg0: memref<8x8xf32, #tpu.memory_space<vmem>>, %arg1: memref<8x128xf32, #tpu.memory_space<vmem>>, %arg2: memref<128x128xf32, #tpu.memory_space<vmem>>, %arg3: memref<128x128xf32, #tpu.memory_space<vmem>>, %arg4: memref<8x128xf32, #tpu.memory_space<vmem>>, %arg5: memref<8x128xf32, #tpu.memory_space<vmem>>) attributes {dimension_semantics = [], scalar_prefetch = 0 : i64, scratch_operands = 0 : i64, tpu.core_type = #tpu.core_type<tc>} {
    %c0 = arith.constant 0 : index
    %c0_0 = arith.constant 0 : index
    %0 = vector.load %arg0[%c0, %c0_0] : memref<8x8xf32, #tpu.memory_space<vmem>>, vector<8x8xf32>
    %c0_1 = arith.constant 0 : index
    %c0_2 = arith.constant 0 : index
    %1 = vector.load %arg4[%c0_1, %c0_2] : memref<8x128xf32, #tpu.memory_space<vmem>>, vector<8x128xf32>
    %2 = vector.extract_strided_slice %1 {offsets = [0, 0], sizes = [1, 128], strides = [1, 1]} : vector<8x128xf32> to vector<1x128xf32>
    %3 = vector.extract_strided_slice %1 {offsets = [1, 0], sizes = [1, 128], strides = [1, 1]} : vector<8x128xf32> to vector<1x128xf32>
    %4 = vector.extract_strided_slice %1 {offsets = [2, 0], sizes = [1, 128], strides = [1, 1]} : vector<8x128xf32> to vector<1x128xf32>
    %c0_3 = arith.constant 0 : index
    %c0_4 = arith.constant 0 : index
    %5 = vector.load %arg1[%c0_3, %c0_4] : memref<8x128xf32, #tpu.memory_space<vmem>>, vector<8x128xf32>
    %cst = arith.constant dense<0.000000e+00> : vector<8x128xf32>
    %6 = tpu.matmul %0, %5, %cst {dimension_numbers = #tpu.dot_dimension_numbers<[1], [0], [0], [1], [0, 0, 1, 1], [], []>} : vector<8x8xf32>, vector<8x128xf32>, vector<8x128xf32> -> vector<8x128xf32>
    %7 = vector.broadcast %2 : vector<1x128xf32> to vector<8x128xf32>
    %8 = arith.addf %6, %7 : vector<8x128xf32>
    %cst_5 = arith.constant 0.000000e+00 : f32
    %9 = vector.broadcast %cst_5 : f32 to vector<8x128xf32>
    %10 = arith.maximumf %8, %9 : vector<8x128xf32>
    %c0_6 = arith.constant 0 : index
    %c0_7 = arith.constant 0 : index
    %11 = vector.load %arg2[%c0_6, %c0_7] : memref<128x128xf32, #tpu.memory_space<vmem>>, vector<128x128xf32>
    %cst_8 = arith.constant dense<0.000000e+00> : vector<8x128xf32>
    %12 = tpu.matmul %10, %11, %cst_8 {dimension_numbers = #tpu.dot_dimension_numbers<[1], [0], [0], [1], [0, 0, 1, 1], [], []>} : vector<8x128xf32>, vector<128x128xf32>, vector<8x128xf32> -> vector<8x128xf32>
    %13 = vector.broadcast %3 : vector<1x128xf32> to vector<8x128xf32>
    %14 = arith.addf %12, %13 : vector<8x128xf32>
    %cst_9 = arith.constant 0.000000e+00 : f32
    %15 = vector.broadcast %cst_9 : f32 to vector<8x128xf32>
    %16 = arith.maximumf %14, %15 : vector<8x128xf32>
    %c0_10 = arith.constant 0 : index
    %c0_11 = arith.constant 0 : index
    %17 = vector.load %arg3[%c0_10, %c0_11] : memref<128x128xf32, #tpu.memory_space<vmem>>, vector<128x128xf32>
    %cst_12 = arith.constant dense<0.000000e+00> : vector<8x128xf32>
    %18 = tpu.matmul %16, %17, %cst_12 {dimension_numbers = #tpu.dot_dimension_numbers<[1], [0], [0], [1], [0, 0, 1, 1], [], []>} : vector<8x128xf32>, vector<128x128xf32>, vector<8x128xf32> -> vector<8x128xf32>
    %19 = vector.broadcast %4 : vector<1x128xf32> to vector<8x128xf32>
    %20 = arith.addf %18, %19 : vector<8x128xf32>
    %21 = tpu.iota {dimensions = array<i32: 1>} : vector<8x128xi32>
    %c4_i32 = arith.constant 4 : i32
    %22 = vector.broadcast %c4_i32 : i32 to vector<8x128xi32>
    %23 = arith.cmpi slt, %21, %22 : vector<8x128xi32>
    %cst_13 = arith.constant 0xFF800000 : f32
    %24 = vector.broadcast %cst_13 : f32 to vector<8x128xf32>
    %25 = arith.select %23, %20, %24 : vector<8x128xi1>, vector<8x128xf32>
    %cst_14 = arith.constant dense<0xFF800000> : vector<8xf32>
    %26 = vector.multi_reduction <maximumf>, %25, %cst_14 [1] : vector<8x128xf32> to vector<8xf32>
    %27 = vector.shape_cast %26 : vector<8xf32> to vector<8x1xf32>
    %c4_i32_15 = arith.constant 4 : i32
    %28 = vector.broadcast %c4_i32_15 : i32 to vector<8x128xi32>
    %29 = arith.cmpi eq, %21, %28 : vector<8x128xi32>
    %cst_16 = arith.constant 0.000000e+00 : f32
    %30 = vector.broadcast %cst_16 : f32 to vector<8x128xf32>
    %31 = arith.select %29, %20, %30 : vector<8x128xi1>, vector<8x128xf32>
    %cst_17 = arith.constant dense<0.000000e+00> : vector<8xf32>
    %32 = vector.multi_reduction <add>, %31, %cst_17 [1] : vector<8x128xf32> to vector<8xf32>
    %33 = vector.shape_cast %32 : vector<8xf32> to vector<8x1xf32>
    %34 = vector.broadcast %27 : vector<8x1xf32> to vector<8x128xf32>
    %35 = arith.subf %20, %34 : vector<8x128xf32>
    %36 = vector.broadcast %33 : vector<8x1xf32> to vector<8x128xf32>
    %37 = arith.addf %36, %35 : vector<8x128xf32>
    %c0_18 = arith.constant 0 : index
    %c0_19 = arith.constant 0 : index
    %38 = vector.load %arg5[%c0_18, %c0_19] : memref<8x128xf32, #tpu.memory_space<vmem>>, vector<8x128xf32>
    tpu.vector_store %arg5[%c0_18, %c0_19], %37 {strides = array<i32>} : memref<8x128xf32, #tpu.memory_space<vmem>>, vector<8x128xf32>,
    return
  }
}

</mosaic_0001>

<bundles_post_ra>
// kernel: tpu_custom_call.1
= control target key start
LH: loop header
LB: loop body
LE: loop exit
PB: predicated region body
PF: predicated region fallthrough
CT: control target
= control target key end

     0   :  { %10 = vsyncpa [#allocation3], 0  ;;  %s446_s0 = inlined_call_operand.hbm [shape: f32[8,8], index: 0, kind: input, shape index: {}]   ;;  %s447_s1 = inlined_call_operand.hbm [shape: f32[8,128], index: 1, kind: input, shape index: {}]   ;;  %s448_s2 = inlined_call_operand.hbm [shape: f32[128,128], index: 2, kind: input, shape index: {}]   ;;  %s449_s3 = inlined_call_operand.hbm [shape: f32[128,128], index: 3, kind: input, shape index: {}]   ;;  %s450_s4 = inlined_call_operand.hbm [shape: f32[8,128], index: 4, kind: input, shape index: {}]   ;;  %s451_s5 = inlined_call_operand.hbm [shape: f32[8,128], index: 5, kind: output, shape index: {}]  }
   0x1   :  { %11 = vsyncpa [#allocation6], 0 }
   0x2   :  { %12 = vsyncpa [#allocation9], 0  ;;  %s30_s20 = sshll.u32 %s447_s1, 4  ;;  %s31_s20 = int_to_ptr.hbm [resolvable:$true] %s30_s20 }
   0x3   :  { %13 = vsyncpa [#allocation4], 0  ;;  %s390_s21 = smov [#allocation5]   ;;  %s53_s25 = sshll.u32 %s449_s3, 4  ;;  %s54_s25 = int_to_ptr.hbm [resolvable:$true] %s53_s25 }
   0x4   :  { %s32_s22 = sshll.u32 %s390_s21, 4  ;;  %s391_s26 = smov [#allocation8]   ;;  %s33_s22 = int_to_ptr.vmem [resolvable:$true] %s32_s22 }
   0x5   :  { %35 = dma.hbm_to_vmem [thread:$0]  %s31_s20, 128, %s33_s22, [#allocation6]  }
   0x6   :  { %s55_s27 = sshll.u32 %s391_s26, 4  ;;  %s19_s30 = sshll.u32 %s446_s0, 4  ;;  %s56_s27 = int_to_ptr.vmem [resolvable:$true] %s55_s27  ;;  %s20_s30 = int_to_ptr.hbm [resolvable:$true] %s19_s30 }
   0x7   :  { %s392_s1 = smov 128   ;;  %s393_s6 = smov 8  }
   0x8   :  { %61 = dma.hbm_to_vmem [thread:$0]  %s54_s25, 2048, %s56_s27, [#allocation9], %s392_s1, %s392_s1, %s393_s6  }
   0x9   :  { %s40_s9 = sshll.u32 %s448_s2, 4  ;;  %s394_s10 = smov [#allocation2]   ;;  %s41_s9 = int_to_ptr.hbm [resolvable:$true] %s40_s9 }
   0xa   :  { %s21_s11 = sshll.u32 %s394_s10, 4  ;;  %s395_s3 = smov [#allocation7]   ;;  %s22_s11 = int_to_ptr.vmem [resolvable:$true] %s21_s11 }
   0xb   :  { %24 = dma.hbm_to_vmem [thread:$0]  %s20_s30, 128, %s22_s11, [#allocation3]  }
   0xc   :  { %s42_s12 = sshll.u32 %s395_s3, 4  ;;  %s67_s0 = sshll.u32 %s450_s4, 4  ;;  %s43_s12 = int_to_ptr.vmem [resolvable:$true] %s42_s12  ;;  %s68_s0 = int_to_ptr.hbm [resolvable:$true] %s67_s0 }
   0xd   :  { %48 = dma.hbm_to_vmem [thread:$0]  %s41_s9, 2048, %s43_s12, [#allocation6], %s392_s1, %s392_s1, %s393_s6  }
   0xe   :  { %s396_s15 = smov [#allocation10]  }
   0xf   :  { %s69_s16 = sshll.u32 %s396_s15, 4  ;;  %s70_s16 = int_to_ptr.vmem [resolvable:$true] %s69_s16 }
  0x10   :  { %72 = dma.hbm_to_vmem [thread:$0]  %s68_s0, 128, %s70_s16, [#allocation9]  }
  0x11   :  { %382 = dma.done.wait [#allocation3], 128  }
  0x12   :  { %383 = vsyncadd [#allocation3], 4294967168 }
  0x13   :  { %384 = dma.done.wait [#allocation6], 2176  }
  0x14   :  { %385 = vsyncadd [#allocation6], 4294965120 }
  0x15   :  { %386 = dma.done.wait [#allocation9], 2176  }
  0x16   :  { %387 = vsyncadd [#allocation9], 4294965120  ;;  %vm97_vm0 = vcmask 64512   ;;  %v95_v0 = vld [vmem:[#allocation5] sm:$0xff]  ;;  %v93_v1 = vld [vmem:[#allocation2] sm:$0xff]  ;;  %v197_v43 = vlaneseq  ;;  %s397_s2 = smov [#allocation11]  }
  0x17   :  { %v137_v2 = vld [vmem:[#allocation7 + $0x78] sm:$0xff]  ;;  %116 = vmatpush.msra.mxu0 %v95_v0  ;;  %v136_v3 = vld [vmem:[#allocation7 + $0x70] sm:$0xff]  ;;  %v135_v4 = vld [vmem:[#allocation7 + $0x68] sm:$0xff]  ;;  %s215_s4 = sshll.u32 %s397_s2, 4  ;;  %s217_s19 = sshll.u32 %s451_s5, 4  ;;  %s216_s4 = int_to_ptr.vmem [resolvable:$true] %s215_s4  ;;  %s218_s19 = int_to_ptr.hbm [resolvable:$true] %s217_s19 }
  0x18   :  { %139 = vmatpush.msra.mxu1 %v137_v2  ;;  %229 = vmatmul.msk.f32.vlgmr.msra.gmra.mxu0 %vm97_vm0, %v93_v1  ;;  %v134_v5 = vld [vmem:[#allocation7 + $0x60] sm:$0xff]  ;;  %v133_v6 = vld [vmem:[#allocation7 + $0x58] sm:$0xff]  ;;  %v132_v7 = vld [vmem:[#allocation7 + $0x50] sm:$0xff]  ;;  %v198_v44 = vand.u32 127, %v197_v43 }
  0x19   :  { %v131_v8 = vld [vmem:[#allocation7 + $0x48] sm:$0xff]  ;;  %v130_v9 = vld [vmem:[#allocation7 + $0x40] sm:$0xff]  ;;  %v129_v10 = vld [vmem:[#allocation7 + $0x38] sm:$0xff] }
  0x1a   :  { %140 = vmatpush.msra.mxu1 %v136_v3  ;;  %v128_v11 = vld [vmem:[#allocation7 + $0x30] sm:$0xff]  ;;  %v127_v12 = vld [vmem:[#allocation7 + $0x28] sm:$0xff]  ;;  %v126_v13 = vld [vmem:[#allocation7 + $0x20] sm:$0xff]  ;;  %vm199_vm1 = vcmp.lt.s32.totalorder %v198_v44, 4  ;;  %vm203_vm2 = vcmp.eq.s32.totalorder %v198_v44, 4 }
  0x1b   :  { %v125_v14 = vld [vmem:[#allocation7 + $0x18] sm:$0xff]  ;;  %v124_v15 = vld [vmem:[#allocation7 + $0x10] sm:$0xff]  ;;  %v123_v16 = vld [vmem:[#allocation7 + $0x8] sm:$0xff] }
  0x1c   :  { %141 = vmatpush.msra.mxu1 %v135_v4  ;;  %v122_v17 = vld [vmem:[#allocation7] sm:$0xff]  ;;  %v175_v18 = vld [vmem:[#allocation8 + $0x78] sm:$0xff]  ;;  %v174_v19 = vld [vmem:[#allocation8 + $0x70] sm:$0xff] }
  0x1d   :  { %177 = vmatpush.msra.mxu2 %v175_v18  ;;  %v173_v20 = vld [vmem:[#allocation8 + $0x68] sm:$0xff]  ;;  %v172_v21 = vld [vmem:[#allocation8 + $0x60] sm:$0xff]  ;;  %v171_v22 = vld [vmem:[#allocation8 + $0x58] sm:$0xff] }
  0x1e   :  { %142 = vmatpush.msra.mxu1 %v134_v5  ;;  %v170_v23 = vld [vmem:[#allocation8 + $0x50] sm:$0xff]  ;;  %v169_v24 = vld [vmem:[#allocation8 + $0x48] sm:$0xff]  ;;  %v168_v25 = vld [vmem:[#allocation8 + $0x40] sm:$0xff] }
  0x1f   :  { %178 = vmatpush.msra.mxu2 %v174_v19  ;;  %v167_v26 = vld [vmem:[#allocation8 + $0x38] sm:$0xff]  ;;  %v166_v27 = vld [vmem:[#allocation8 + $0x30] sm:$0xff]  ;;  %v165_v28 = vld [vmem:[#allocation8 + $0x28] sm:$0xff] }
  0x20   :  { %143 = vmatpush.msra.mxu1 %v133_v6  ;;  %v164_v29 = vld [vmem:[#allocation8 + $0x20] sm:$0xff]  ;;  %v163_v31 = vld [vmem:[#allocation8 + $0x18] sm:$0xff]  ;;  %v162_v36 = vld [vmem:[#allocation8 + $0x10] sm:$0xff] }
  0x21   :  { %179 = vmatpush.msra.mxu2 %v173_v20  ;;  %v94_v30 = vld [vmem:[#allocation10] sm:$0xff]  ;;  %v161_v37 = vld [vmem:[#allocation8 + $0x8] sm:$0xff] }
  0x22   :  { %144 = vmatpush.msra.mxu1 %v132_v7  ;;  %v96_v32 = vperm.slane %v94_v30, 0  ;;  %v160_v38 = vld [vmem:[#allocation8] sm:$0xff]  ;;  %v138_v39 = vperm.slane %v94_v30, 1  ;;  %v176_v45 = vperm.slane %v94_v30, 2 }
  0x23   :  { %180 = vmatpush.msra.mxu2 %v172_v21 }
  0x24   :  { %145 = vmatpush.msra.mxu1 %v131_v8 }
  0x25   :  { %181 = vmatpush.msra.mxu2 %v171_v22 }
  0x26   :  { %146 = vmatpush.msra.mxu1 %v130_v9 }
  0x27   :  { %182 = vmatpush.msra.mxu2 %v170_v23 }
  0x28   :  { %147 = vmatpush.msra.mxu1 %v129_v10 }
  0x29   :  { %183 = vmatpush.msra.mxu2 %v169_v24 }
  0x2a   :  { %148 = vmatpush.msra.mxu1 %v128_v11 }
  0x2b   :  { %184 = vmatpush.msra.mxu2 %v168_v25 }
  0x2c   :  { %149 = vmatpush.msra.mxu1 %v127_v12 }
  0x2d   :  { %185 = vmatpush.msra.mxu2 %v167_v26 }
  0x2e   :  { %150 = vmatpush.msra.mxu1 %v126_v13 }
  0x2f   :  { %186 = vmatpush.msra.mxu2 %v166_v27 }
  0x30   :  { %151 = vmatpush.msra.mxu1 %v125_v14 }
  0x31   :  { %187 = vmatpush.msra.mxu2 %v165_v28 }
  0x32   :  { %152 = vmatpush.msra.mxu1 %v124_v15 }
  0x33   :  { %188 = vmatpush.msra.mxu2 %v164_v29 }
  0x34   :  { %153 = vmatpush.msra.mxu1 %v123_v16 }
  0x35   :  { %189 = vmatpush.msra.mxu2 %v163_v31 }
  0x36   :  { %154 = vmatpush.msra.mxu1 %v122_v17 }
  0x37   :  { %190 = vmatpush.msra.mxu2 %v162_v36 }
  0x39   :  { %191 = vmatpush.msra.mxu2 %v161_v37 }
  0x3b   :  { %192 = vmatpush.msra.mxu2 %v160_v38 }
  0x95   :  { %v118_v33 = vpop.f32.mrf.mxu0 }
  0x96   :  { %v119_v34 = vadd.f32 %v118_v33, %v96_v32 }
  0x98   :  { %v121_v35 = vmax.f32 %v119_v34, 0.0 }
  0x9a   :  { %155 = vmatmul.f32.vlgmr.msra.gmra.mxu1 %v121_v35 }
 0x117   :  { %v156_v40 = vpop.f32.mrf.mxu1 }
 0x118   :  { %v157_v41 = vadd.f32 %v156_v40, %v138_v39 }
 0x11a   :  { %v159_v42 = vmax.f32 %v157_v41, 0.0 }
 0x11c   :  { %193 = vmatmul.f32.vlgmr.msra.gmra.mxu2 %v159_v42 }
 0x19f   :  { %v194_v46 = vpop.f32.mrf.mxu2 }
 0x1a0   :  { %v195_v47 = vadd.f32 %v194_v46, %v176_v45 }
 0x1a2   :  { %v200_v48 = vsel %vm199_vm1, %v195_v47, -inf  ;;  %v204_v49 = vsel %vm203_vm2, %v195_v47, 0.0 }
 0x1a3   :  { %201 = vmax.xlane.f32.xlu0 %v200_v48 }
 0x1ab   :  { %205 = vadd.xlane.f32.xlu0 %v204_v49 }
 0x216   :  { %v202_v50 = vpop.xlane.xlu0 %201 }
 0x217   :  { %v207_v51 = vsub.f32 %v195_v47, %v202_v50 }
 0x21e   :  { %v206_v52 = vpop.xlane.xlu0 %205 }
 0x21f   :  { %v208_v53 = vadd.f32 %v207_v51, %v206_v52 }
 0x221   :  { %209 = vst [vmem:[#allocation11] sm:$0xff] %v208_v53 }
 0x222   :  { %220 = dma.vmem_to_hbm [thread:$0]  %s216_s4, 128, %s218_s19, [#allocation4]  }
 0x223   :  { %388 = dma.done.wait [#allocation4], 128  }
 0x224   :  { %389 = vsyncadd [#allocation4], 4294967168 }
 0x225   :  { %225 = vsyncpa [#allocation3], 1 }
 0x226   :  { %226 = vsyncpa [#allocation6], 1 }
 0x227   :  { %227 = vsyncpa [#allocation9], 1 }
 0x228   :  { %228 = vsyncpa [#allocation4], 1 }

</bundles_post_ra>
